<compile_context>
chip_gen: v5e
topology: v5e:2x2
jax: 0.10.0
libtpu: 0.0.40
codegen_flags: <defaults>
</compile_context>

<pallas_src>
import functools

import jax
import jax.numpy as jnp
from jax import lax
from jax.experimental import pallas as pl
from jax.experimental.pallas import tpu as pltpu


# ----------------------------------------------------------------------------
# Kernel: one invocation processes the entire (B*S, D) batch slab.
# ----------------------------------------------------------------------------
def _pool_heads_kernel(x_ref, wqkv_ref, bqkv_ref, wp_ref, misc_ref, mask_ref,
                       out_ref, *, n_heads):
    x = x_ref[...]                                      # (BS, D) float32
    BS, D = x.shape
    KD = D // n_heads

    # Fused QKV projection for the whole batch: (BS, 3D), [K heads|Q heads|V heads].
    qkv = jnp.dot(x, wqkv_ref[...],
                  preferred_element_type=jnp.float32) + bqkv_ref[...]

    wp = wp_ref[...]                                    # (D, D)
    mask = mask_ref[...]                                # (BS, BS): 0 / -1e9 block-diag
    pooled = jnp.zeros((BS, D), jnp.float32)

    for h in range(n_heads):                            # small static unroll
        k = qkv[:, h * KD:(h + 1) * KD]                 # (BS, KD)
        q = qkv[:, D + h * KD: D + (h + 1) * KD]        # (BS, KD)
        v = qkv[:, 2 * D + h * KD: 2 * D + (h + 1) * KD]

        # Scores for ALL sequences at once: K @ Q^T via last-dim contraction
        # (no XLU transpose, no 1/sqrt(d) scaling -- matches the PyTorch module).
        s = lax.dot_general(k, q, (((1,), (1,)), ((), ())),
                            preferred_element_type=jnp.float32)      # (BS, BS)
        # Restrict attention to within each sequence: cross-sequence entries get
        # -1e9, so exp underflows to exactly 0 and they contribute nothing to
        # the row softmax (result identical to per-sequence softmax).
        s = s + mask
        s = s - jnp.max(s, axis=-1, keepdims=True)
        p = jnp.exp(s)
        denom = jnp.sum(p, axis=-1, keepdims=True)
        inv = pl.reciprocal(denom, approx=True)         # EUP slot (otherwise idle)
        inv = inv * (2.0 - denom * inv)                 # one Newton step (free, keeps accuracy)
        attn = p * inv

        head = jnp.dot(attn, v, preferred_element_type=jnp.float32)  # (BS, KD)
        # Fold concat([head_0..head_{H-1}]) @ Wp into per-head accumulation.
        pooled = pooled + jnp.dot(head, wp[h * KD:(h + 1) * KD, :],
                                  preferred_element_type=jnp.float32)

    misc = misc_ref[...]                                # (3, D): [bp; gamma; beta]
    bp = misc[0:1, :]
    gamma = misc[1:2, :]
    beta = misc[2:3, :]

    # pooler bias + residual (config.residual = True)
    y = pooled + bp + x

    # LayerNorm over last dim (eps=1e-5, biased variance, as torch.nn.LayerNorm)
    mean = jnp.mean(y, axis=-1, keepdims=True)
    var = jnp.mean((y - mean) ** 2, axis=-1, keepdims=True)
    out_ref[...] = ((y - mean) * lax.rsqrt(var + 1e-5)) * gamma + beta


# ----------------------------------------------------------------------------
# Wrapper: fuse params once, flatten batch, single pallas_call (no grid).
# ----------------------------------------------------------------------------
def pool_heads_forward(x, params):
    """x: (B, S, D) float32. params: stacked per-head + pooler + LN params."""
    B, S, D = x.shape
    H = params["wk"].shape[0]
    BS = B * S

    def cat_heads(w):  # (H, D, KD) -> (D, H*KD), head-major along the out axis
        return jnp.transpose(w, (1, 0, 2)).reshape(D, -1)

    w_qkv = jnp.concatenate([cat_heads(params["wk"]),
                             cat_heads(params["wq"]),
                             cat_heads(params["wv"])], axis=-1)          # (D, 3D)
    b_qkv = jnp.concatenate([params["bk"].reshape(1, -1),
                             params["bq"].reshape(1, -1),
                             params["bv"].reshape(1, -1)], axis=-1)      # (1, 3D)
    misc = jnp.concatenate([params["bp"], params["gamma"], params["beta"]],
                           axis=0)                                       # (3, D)

    # Block-diagonal additive attention mask keeping each sequence independent.
    seq_id = jnp.arange(BS, dtype=jnp.int32) // S
    mask = jnp.where(seq_id[:, None] == seq_id[None, :],
                     0.0, -1e9).astype(jnp.float32)                      # (BS, BS)

    x_slab = x.reshape(BS, D)   # metadata-only reshape (leading-dim merge)

    kernel = functools.partial(_pool_heads_kernel, n_heads=H)

    out_slab = pl.pallas_call(
        kernel,
        out_shape=jax.ShapeDtypeStruct((BS, D), jnp.float32),
        in_specs=[pl.BlockSpec(memory_space=pltpu.MemorySpace.VMEM)] * 6,
        out_specs=pl.BlockSpec(memory_space=pltpu.MemorySpace.VMEM),
    )(x_slab, w_qkv, b_qkv, params["wp"], misc, mask)

    return out_slab.reshape(B, S, D)


# ----------------------------------------------------------------------------
# Pure-JAX reference (mirrors the PyTorch forward), vmapped over batch.
# Matmuls run at HIGHEST precision so the reference is the "true" f32 value.
# ----------------------------------------------------------------------------
def pool_heads_reference(x, params):
    H = params["wk"].shape[0]
    hi = jax.lax.Precision.HIGHEST

    def single(xs):  # xs: (S, D)
        outs = []
        for h in range(H):
            k = jnp.dot(xs, params["wk"][h], precision=hi) + params["bk"][h]
            q = jnp.dot(xs, params["wq"][h], precision=hi) + params["bq"][h]
            v = jnp.dot(xs, params["wv"][h], precision=hi) + params["bv"][h]
            attn = jax.nn.softmax(jnp.dot(k, q.T, precision=hi), axis=-1)
            outs.append(jnp.dot(attn, v, precision=hi))
        cat = jnp.concatenate(outs, axis=-1)
        y = jnp.dot(cat, params["wp"], precision=hi) + params["bp"] + xs
        mean = jnp.mean(y, axis=-1, keepdims=True)
        var = jnp.mean((y - mean) ** 2, axis=-1, keepdims=True)
        return (y - mean) / jnp.sqrt(var + 1e-5) * params["gamma"] + params["beta"]

    return jax.vmap(single)(x)


# ----------------------------------------------------------------------------
# Deterministic parameter construction + run
# ----------------------------------------------------------------------------
if __name__ == "__main__":
    B = 4          # batch of sequences
    S = 8          # sequence length
    D = 32         # n_model
    H = 4          # n_heads
    KD = D // H    # key_dim per head

    key = jax.random.PRNGKey(0)
    keys = jax.random.split(key, 9)
    scale = 0.1

    params = {
        # per-head projection weights stacked (H, D, KD); biases (H, 1, KD)
        # (stored pre-transposed as (in, out): kernel computes x @ W + b)
        "wk": scale * jax.random.normal(keys[0], (H, D, KD), jnp.float32),
        "bk": scale * jax.random.normal(keys[1], (H, 1, KD), jnp.float32),
        "wq": scale * jax.random.normal(keys[2], (H, D, KD), jnp.float32),
        "bq": scale * jax.random.normal(keys[3], (H, 1, KD), jnp.float32),
        "wv": scale * jax.random.normal(keys[4], (H, D, KD), jnp.float32),
        "bv": scale * jax.random.normal(keys[5], (H, 1, KD), jnp.float32),
        # pooler: (D, D) weight (in, out), bias (1, D)
        "wp": scale * jax.random.normal(keys[6], (D, D), jnp.float32),
        "bp": scale * jax.random.normal(keys[7], (1, D), jnp.float32),
        # LayerNorm affine params
        "gamma": jnp.ones((1, D), jnp.float32),
        "beta": jnp.zeros((1, D), jnp.float32),
    }

    x = jax.random.normal(keys[8], (B, S, D), jnp.float32)

    out = jax.block_until_ready(pool_heads_forward(x, params))
    ref = pool_heads_reference(x, params)

    assert out.shape == (B, S, D) and out.dtype == jnp.float32
    # Tolerance budget: kernel matmuls run on the MXU (multi-pass f32) while the
    # reference uses XLA HIGHEST-precision dots; 1e-2 comfortably covers any
    # pass-decomposition rounding difference while still catching logic errors.
    assert jnp.allclose(out, ref, atol=1e-2, rtol=1e-2), "mismatch vs JAX reference"

    print("KERNEL_OK")
</pallas_src>

<mosaic_0001>
module attributes {stable_mosaic.version = 11 : i64} {
  func.func @_pool_heads_kernel(%arg0: memref<32x32xf32, #tpu.memory_space<vmem>>, %arg1: memref<32x96xf32, #tpu.memory_space<vmem>>, %arg2: memref<1x96xf32, #tpu.memory_space<vmem>>, %arg3: memref<32x32xf32, #tpu.memory_space<vmem>>, %arg4: memref<3x32xf32, #tpu.memory_space<vmem>>, %arg5: memref<32x32xf32, #tpu.memory_space<vmem>>, %arg6: memref<32x32xf32, #tpu.memory_space<vmem>>) attributes {dimension_semantics = [], scalar_prefetch = 0 : i64, scratch_operands = 0 : i64, tpu.core_type = #tpu.core_type<tc>} {
    %c0 = arith.constant 0 : index
    %c0_0 = arith.constant 0 : index
    %0 = vector.load %arg0[%c0, %c0_0] : memref<32x32xf32, #tpu.memory_space<vmem>>, vector<32x32xf32>
    %c0_1 = arith.constant 0 : index
    %c0_2 = arith.constant 0 : index
    %1 = vector.load %arg1[%c0_1, %c0_2] : memref<32x96xf32, #tpu.memory_space<vmem>>, vector<32x96xf32>
    %cst = arith.constant dense<0.000000e+00> : vector<32x96xf32>
    %2 = tpu.matmul %0, %1, %cst {dimension_numbers = #tpu.dot_dimension_numbers<[1], [0], [0], [1], [0, 0, 1, 1], [], []>} : vector<32x32xf32>, vector<32x96xf32>, vector<32x96xf32> -> vector<32x96xf32>
    %c0_3 = arith.constant 0 : index
    %c0_4 = arith.constant 0 : index
    %3 = vector.load %arg2[%c0_3, %c0_4] : memref<1x96xf32, #tpu.memory_space<vmem>>, vector<1x96xf32>
    %4 = vector.broadcast %3 : vector<1x96xf32> to vector<32x96xf32>
    %5 = arith.addf %2, %4 : vector<32x96xf32>
    %c0_5 = arith.constant 0 : index
    %c0_6 = arith.constant 0 : index
    %6 = vector.load %arg3[%c0_5, %c0_6] : memref<32x32xf32, #tpu.memory_space<vmem>>, vector<32x32xf32>
    %c0_7 = arith.constant 0 : index
    %c0_8 = arith.constant 0 : index
    %7 = vector.load %arg5[%c0_7, %c0_8] : memref<32x32xf32, #tpu.memory_space<vmem>>, vector<32x32xf32>
    %cst_9 = arith.constant 0.000000e+00 : f32
    %8 = vector.broadcast %cst_9 : f32 to vector<32x32xf32>
    %9 = vector.extract_strided_slice %5 {offsets = [0, 0], sizes = [32, 8], strides = [1, 1]} : vector<32x96xf32> to vector<32x8xf32>
    %10 = vector.extract_strided_slice %5 {offsets = [0, 32], sizes = [32, 8], strides = [1, 1]} : vector<32x96xf32> to vector<32x8xf32>
    %11 = vector.extract_strided_slice %5 {offsets = [0, 64], sizes = [32, 8], strides = [1, 1]} : vector<32x96xf32> to vector<32x8xf32>
    %cst_10 = arith.constant dense<0.000000e+00> : vector<32x32xf32>
    %12 = tpu.matmul %9, %10, %cst_10 {dimension_numbers = #tpu.dot_dimension_numbers<[1], [1], [0], [0], [0, 0, 1, 0], [], []>} : vector<32x8xf32>, vector<32x8xf32>, vector<32x32xf32> -> vector<32x32xf32>
    %13 = arith.addf %12, %7 : vector<32x32xf32>
    %cst_11 = arith.constant dense<0xFF800000> : vector<32xf32>
    %14 = vector.multi_reduction <maximumf>, %13, %cst_11 [1] : vector<32x32xf32> to vector<32xf32>
    %15 = vector.shape_cast %14 : vector<32xf32> to vector<32x1xf32>
    %16 = vector.broadcast %15 : vector<32x1xf32> to vector<32x32xf32>
    %17 = arith.subf %13, %16 : vector<32x32xf32>
    %18 = math.exp %17 : vector<32x32xf32>
    %cst_12 = arith.constant dense<0.000000e+00> : vector<32xf32>
    %19 = vector.multi_reduction <add>, %18, %cst_12 [1] : vector<32x32xf32> to vector<32xf32>
    %20 = vector.shape_cast %19 : vector<32xf32> to vector<32x1xf32>
    %21 = tpu.reciprocal %20 {approx = true} : vector<32x1xf32> -> vector<32x1xf32>
    %22 = arith.mulf %20, %21 : vector<32x1xf32>
    %cst_13 = arith.constant 2.000000e+00 : f32
    %23 = vector.broadcast %cst_13 : f32 to vector<32x1xf32>
    %24 = arith.subf %23, %22 : vector<32x1xf32>
    %25 = arith.mulf %21, %24 : vector<32x1xf32>
    %26 = vector.broadcast %25 : vector<32x1xf32> to vector<32x32xf32>
    %27 = arith.mulf %18, %26 : vector<32x32xf32>
    %cst_14 = arith.constant dense<0.000000e+00> : vector<32x8xf32>
    %28 = tpu.matmul %27, %11, %cst_14 {dimension_numbers = #tpu.dot_dimension_numbers<[1], [0], [0], [1], [0, 0, 1, 1], [], []>} : vector<32x32xf32>, vector<32x8xf32>, vector<32x8xf32> -> vector<32x8xf32>
    %29 = vector.extract_strided_slice %6 {offsets = [0, 0], sizes = [8, 32], strides = [1, 1]} : vector<32x32xf32> to vector<8x32xf32>
    %cst_15 = arith.constant dense<0.000000e+00> : vector<32x32xf32>
    %30 = tpu.matmul %28, %29, %cst_15 {dimension_numbers = #tpu.dot_dimension_numbers<[1], [0], [0], [1], [0, 0, 1, 1], [], []>} : vector<32x8xf32>, vector<8x32xf32>, vector<32x32xf32> -> vector<32x32xf32>
    %31 = arith.addf %8, %30 : vector<32x32xf32>
    %32 = vector.extract_strided_slice %5 {offsets = [0, 8], sizes = [32, 8], strides = [1, 1]} : vector<32x96xf32> to vector<32x8xf32>
    %33 = vector.extract_strided_slice %5 {offsets = [0, 40], sizes = [32, 8], strides = [1, 1]} : vector<32x96xf32> to vector<32x8xf32>
    %34 = vector.extract_strided_slice %5 {offsets = [0, 72], sizes = [32, 8], strides = [1, 1]} : vector<32x96xf32> to vector<32x8xf32>
    %cst_16 = arith.constant dense<0.000000e+00> : vector<32x32xf32>
    %35 = tpu.matmul %32, %33, %cst_16 {dimension_numbers = #tpu.dot_dimension_numbers<[1], [1], [0], [0], [0, 0, 1, 0], [], []>} : vector<32x8xf32>, vector<32x8xf32>, vector<32x32xf32> -> vector<32x32xf32>
    %36 = arith.addf %35, %7 : vector<32x32xf32>
    %cst_17 = arith.constant dense<0xFF800000> : vector<32xf32>
    %37 = vector.multi_reduction <maximumf>, %36, %cst_17 [1] : vector<32x32xf32> to vector<32xf32>
    %38 = vector.shape_cast %37 : vector<32xf32> to vector<32x1xf32>
    %39 = vector.broadcast %38 : vector<32x1xf32> to vector<32x32xf32>
    %40 = arith.subf %36, %39 : vector<32x32xf32>
    %41 = math.exp %40 : vector<32x32xf32>
    %cst_18 = arith.constant dense<0.000000e+00> : vector<32xf32>
    %42 = vector.multi_reduction <add>, %41, %cst_18 [1] : vector<32x32xf32> to vector<32xf32>
    %43 = vector.shape_cast %42 : vector<32xf32> to vector<32x1xf32>
    %44 = tpu.reciprocal %43 {approx = true} : vector<32x1xf32> -> vector<32x1xf32>
    %45 = arith.mulf %43, %44 : vector<32x1xf32>
    %cst_19 = arith.constant 2.000000e+00 : f32
    %46 = vector.broadcast %cst_19 : f32 to vector<32x1xf32>
    %47 = arith.subf %46, %45 : vector<32x1xf32>
    %48 = arith.mulf %44, %47 : vector<32x1xf32>
    %49 = vector.broadcast %48 : vector<32x1xf32> to vector<32x32xf32>
    %50 = arith.mulf %41, %49 : vector<32x32xf32>
    %cst_20 = arith.constant dense<0.000000e+00> : vector<32x8xf32>
    %51 = tpu.matmul %50, %34, %cst_20 {dimension_numbers = #tpu.dot_dimension_numbers<[1], [0], [0], [1], [0, 0, 1, 1], [], []>} : vector<32x32xf32>, vector<32x8xf32>, vector<32x8xf32> -> vector<32x8xf32>
    %52 = vector.extract_strided_slice %6 {offsets = [8, 0], sizes = [8, 32], strides = [1, 1]} : vector<32x32xf32> to vector<8x32xf32>
    %cst_21 = arith.constant dense<0.000000e+00> : vector<32x32xf32>
    %53 = tpu.matmul %51, %52, %cst_21 {dimension_numbers = #tpu.dot_dimension_numbers<[1], [0], [0], [1], [0, 0, 1, 1], [], []>} : vector<32x8xf32>, vector<8x32xf32>, vector<32x32xf32> -> vector<32x32xf32>
    %54 = arith.addf %31, %53 : vector<32x32xf32>
    %55 = vector.extract_strided_slice %5 {offsets = [0, 16], sizes = [32, 8], strides = [1, 1]} : vector<32x96xf32> to vector<32x8xf32>
    %56 = vector.extract_strided_slice %5 {offsets = [0, 48], sizes = [32, 8], strides = [1, 1]} : vector<32x96xf32> to vector<32x8xf32>
    %57 = vector.extract_strided_slice %5 {offsets = [0, 80], sizes = [32, 8], strides = [1, 1]} : vector<32x96xf32> to vector<32x8xf32>
    %cst_22 = arith.constant dense<0.000000e+00> : vector<32x32xf32>
    %58 = tpu.matmul %55, %56, %cst_22 {dimension_numbers = #tpu.dot_dimension_numbers<[1], [1], [0], [0], [0, 0, 1, 0], [], []>} : vector<32x8xf32>, vector<32x8xf32>, vector<32x32xf32> -> vector<32x32xf32>
    %59 = arith.addf %58, %7 : vector<32x32xf32>
    %cst_23 = arith.constant dense<0xFF800000> : vector<32xf32>
    %60 = vector.multi_reduction <maximumf>, %59, %cst_23 [1] : vector<32x32xf32> to vector<32xf32>
    %61 = vector.shape_cast %60 : vector<32xf32> to vector<32x1xf32>
    %62 = vector.broadcast %61 : vector<32x1xf32> to vector<32x32xf32>
    %63 = arith.subf %59, %62 : vector<32x32xf32>
    %64 = math.exp %63 : vector<32x32xf32>
    %cst_24 = arith.constant dense<0.000000e+00> : vector<32xf32>
    %65 = vector.multi_reduction <add>, %64, %cst_24 [1] : vector<32x32xf32> to vector<32xf32>
    %66 = vector.shape_cast %65 : vector<32xf32> to vector<32x1xf32>
    %67 = tpu.reciprocal %66 {approx = true} : vector<32x1xf32> -> vector<32x1xf32>
    %68 = arith.mulf %66, %67 : vector<32x1xf32>
    %cst_25 = arith.constant 2.000000e+00 : f32
    %69 = vector.broadcast %cst_25 : f32 to vector<32x1xf32>
    %70 = arith.subf %69, %68 : vector<32x1xf32>
    %71 = arith.mulf %67, %70 : vector<32x1xf32>
    %72 = vector.broadcast %71 : vector<32x1xf32> to vector<32x32xf32>
    %73 = arith.mulf %64, %72 : vector<32x32xf32>
    %cst_26 = arith.constant dense<0.000000e+00> : vector<32x8xf32>
    %74 = tpu.matmul %73, %57, %cst_26 {dimension_numbers = #tpu.dot_dimension_numbers<[1], [0], [0], [1], [0, 0, 1, 1], [], []>} : vector<32x32xf32>, vector<32x8xf32>, vector<32x8xf32> -> vector<32x8xf32>
    %75 = vector.extract_strided_slice %6 {offsets = [16, 0], sizes = [8, 32], strides = [1, 1]} : vector<32x32xf32> to vector<8x32xf32>
    %cst_27 = arith.constant dense<0.000000e+00> : vector<32x32xf32>
    %76 = tpu.matmul %74, %75, %cst_27 {dimension_numbers = #tpu.dot_dimension_numbers<[1], [0], [0], [1], [0, 0, 1, 1], [], []>} : vector<32x8xf32>, vector<8x32xf32>, vector<32x32xf32> -> vector<32x32xf32>
    %77 = arith.addf %54, %76 : vector<32x32xf32>
    %78 = vector.extract_strided_slice %5 {offsets = [0, 24], sizes = [32, 8], strides = [1, 1]} : vector<32x96xf32> to vector<32x8xf32>
    %79 = vector.extract_strided_slice %5 {offsets = [0, 56], sizes = [32, 8], strides = [1, 1]} : vector<32x96xf32> to vector<32x8xf32>
    %80 = vector.extract_strided_slice %5 {offsets = [0, 88], sizes = [32, 8], strides = [1, 1]} : vector<32x96xf32> to vector<32x8xf32>
    %cst_28 = arith.constant dense<0.000000e+00> : vector<32x32xf32>
    %81 = tpu.matmul %78, %79, %cst_28 {dimension_numbers = #tpu.dot_dimension_numbers<[1], [1], [0], [0], [0, 0, 1, 0], [], []>} : vector<32x8xf32>, vector<32x8xf32>, vector<32x32xf32> -> vector<32x32xf32>
    %82 = arith.addf %81, %7 : vector<32x32xf32>
    %cst_29 = arith.constant dense<0xFF800000> : vector<32xf32>
    %83 = vector.multi_reduction <maximumf>, %82, %cst_29 [1] : vector<32x32xf32> to vector<32xf32>
    %84 = vector.shape_cast %83 : vector<32xf32> to vector<32x1xf32>
    %85 = vector.broadcast %84 : vector<32x1xf32> to vector<32x32xf32>
    %86 = arith.subf %82, %85 : vector<32x32xf32>
    %87 = math.exp %86 : vector<32x32xf32>
    %cst_30 = arith.constant dense<0.000000e+00> : vector<32xf32>
    %88 = vector.multi_reduction <add>, %87, %cst_30 [1] : vector<32x32xf32> to vector<32xf32>
    %89 = vector.shape_cast %88 : vector<32xf32> to vector<32x1xf32>
    %90 = tpu.reciprocal %89 {approx = true} : vector<32x1xf32> -> vector<32x1xf32>
    %91 = arith.mulf %89, %90 : vector<32x1xf32>
    %cst_31 = arith.constant 2.000000e+00 : f32
    %92 = vector.broadcast %cst_31 : f32 to vector<32x1xf32>
    %93 = arith.subf %92, %91 : vector<32x1xf32>
    %94 = arith.mulf %90, %93 : vector<32x1xf32>
    %95 = vector.broadcast %94 : vector<32x1xf32> to vector<32x32xf32>
    %96 = arith.mulf %87, %95 : vector<32x32xf32>
    %cst_32 = arith.constant dense<0.000000e+00> : vector<32x8xf32>
    %97 = tpu.matmul %96, %80, %cst_32 {dimension_numbers = #tpu.dot_dimension_numbers<[1], [0], [0], [1], [0, 0, 1, 1], [], []>} : vector<32x32xf32>, vector<32x8xf32>, vector<32x8xf32> -> vector<32x8xf32>
    %98 = vector.extract_strided_slice %6 {offsets = [24, 0], sizes = [8, 32], strides = [1, 1]} : vector<32x32xf32> to vector<8x32xf32>
    %cst_33 = arith.constant dense<0.000000e+00> : vector<32x32xf32>
    %99 = tpu.matmul %97, %98, %cst_33 {dimension_numbers = #tpu.dot_dimension_numbers<[1], [0], [0], [1], [0, 0, 1, 1], [], []>} : vector<32x8xf32>, vector<8x32xf32>, vector<32x32xf32> -> vector<32x32xf32>
    %100 = arith.addf %77, %99 : vector<32x32xf32>
    %c0_34 = arith.constant 0 : index
    %c0_35 = arith.constant 0 : index
    %101 = vector.load %arg4[%c0_34, %c0_35] : memref<3x32xf32, #tpu.memory_space<vmem>>, vector<3x32xf32>
    %102 = vector.extract_strided_slice %101 {offsets = [0, 0], sizes = [1, 32], strides = [1, 1]} : vector<3x32xf32> to vector<1x32xf32>
    %103 = vector.extract_strided_slice %101 {offsets = [1, 0], sizes = [1, 32], strides = [1, 1]} : vector<3x32xf32> to vector<1x32xf32>
    %104 = vector.extract_strided_slice %101 {offsets = [2, 0], sizes = [1, 32], strides = [1, 1]} : vector<3x32xf32> to vector<1x32xf32>
    %105 = vector.broadcast %102 : vector<1x32xf32> to vector<32x32xf32>
    %106 = arith.addf %100, %105 : vector<32x32xf32>
    %107 = arith.addf %106, %0 : vector<32x32xf32>
    %cst_36 = arith.constant dense<0.000000e+00> : vector<32xf32>
    %108 = vector.multi_reduction <add>, %107, %cst_36 [1] : vector<32x32xf32> to vector<32xf32>
    %109 = vector.shape_cast %108 : vector<32xf32> to vector<32x1xf32>
    %cst_37 = arith.constant 3.200000e+01 : f32
    %110 = vector.broadcast %cst_37 : f32 to vector<32x1xf32>
    %111 = arith.divf %109, %110 : vector<32x1xf32>
    %112 = vector.broadcast %111 : vector<32x1xf32> to vector<32x32xf32>
    %113 = arith.subf %107, %112 : vector<32x32xf32>
    %114 = arith.mulf %113, %113 : vector<32x32xf32>
    %cst_38 = arith.constant dense<0.000000e+00> : vector<32xf32>
    %115 = vector.multi_reduction <add>, %114, %cst_38 [1] : vector<32x32xf32> to vector<32xf32>
    %116 = vector.shape_cast %115 : vector<32xf32> to vector<32x1xf32>
    %cst_39 = arith.constant 3.200000e+01 : f32
    %117 = vector.broadcast %cst_39 : f32 to vector<32x1xf32>
    %118 = arith.divf %116, %117 : vector<32x1xf32>
    %119 = vector.broadcast %111 : vector<32x1xf32> to vector<32x32xf32>
    %120 = arith.subf %107, %119 : vector<32x32xf32>
    %cst_40 = arith.constant 9.99999974E-6 : f32
    %121 = vector.broadcast %cst_40 : f32 to vector<32x1xf32>
    %122 = arith.addf %118, %121 : vector<32x1xf32>
    %123 = math.rsqrt %122 : vector<32x1xf32>
    %124 = vector.broadcast %123 : vector<32x1xf32> to vector<32x32xf32>
    %125 = arith.mulf %120, %124 : vector<32x32xf32>
    %126 = vector.broadcast %103 : vector<1x32xf32> to vector<32x32xf32>
    %127 = arith.mulf %125, %126 : vector<32x32xf32>
    %128 = vector.broadcast %104 : vector<1x32xf32> to vector<32x32xf32>
    %129 = arith.addf %127, %128 : vector<32x32xf32>
    %c0_41 = arith.constant 0 : index
    %c0_42 = arith.constant 0 : index
    %130 = vector.load %arg6[%c0_41, %c0_42] : memref<32x32xf32, #tpu.memory_space<vmem>>, vector<32x32xf32>
    tpu.vector_store %arg6[%c0_41, %c0_42], %129 {strides = array<i32>} : memref<32x32xf32, #tpu.memory_space<vmem>>, vector<32x32xf32>,
    return
  }
}

</mosaic_0001>

<bundles_post_ra>
// kernel: tpu_custom_call.1
= control target key start
LH: loop header
LB: loop body
LE: loop exit
PB: predicated region body
PF: predicated region fallthrough
CT: control target
= control target key end

     0   :  { %11 = vsyncpa [#allocation3], 0  ;;  %s1917_s0 = inlined_call_operand.hbm [shape: f32[32,32], index: 0, kind: input, shape index: {}]   ;;  %s1918_s1 = inlined_call_operand.hbm [shape: f32[32,96], index: 1, kind: input, shape index: {}]   ;;  %s1919_s2 = inlined_call_operand.vmem [shape: f32[1,96], index: 2, kind: input, shape index: {}]   ;;  %s1920_s3 = inlined_call_operand.hbm [shape: f32[32,32], index: 3, kind: input, shape index: {}]   ;;  %s1921_s4 = inlined_call_operand.hbm [shape: f32[3,32], index: 4, kind: input, shape index: {}]   ;;  %s1922_s5 = inlined_call_operand.hbm [shape: f32[32,32], index: 5, kind: input, shape index: {}]   ;;  %s1923_s6 = inlined_call_operand.hbm [shape: f32[32,32], index: 6, kind: output, shape index: {}]  }
   0x1   :  { %12 = vsyncpa [#allocation6], 0 }
   0x2   :  { %13 = vsyncpa [#allocation9], 0 }
   0x3   :  { %14 = vsyncpa [#allocation4], 0  ;;  %s32_s23 = sshll.u32 %s1918_s1, 4  ;;  %s1514_s24 = smov [#allocation5]   ;;  %s33_s23 = int_to_ptr.hbm [resolvable:$true] %s32_s23 }
   0x4   :  { %s34_s25 = sshll.u32 %s1514_s24, 4  ;;  %s61_s28 = sshll.u32 %s1921_s4, 4  ;;  %s35_s25 = int_to_ptr.vmem [resolvable:$true] %s34_s25  ;;  %s62_s28 = int_to_ptr.hbm [resolvable:$true] %s61_s28 }
   0x5   :  { %s1515_s29 = smov 128   ;;  %s1516_s30 = smov 8  }
   0x6   :  { %40 = dma.hbm_to_vmem [thread:$0]  %s33_s23, 512, %s35_s25, [#allocation6], %s1515_s29, %s1515_s29, %s1516_s30  }
   0x7   :  { %s1517_s7 = smov [#allocation8]   ;;  %s19_s1 = sshll.u32 %s1917_s0, 4  ;;  %s20_s1 = int_to_ptr.hbm [resolvable:$true] %s19_s1 }
   0x8   :  { %s63_s8 = sshll.u32 %s1517_s7, 4  ;;  %s47_s4 = sshll.u32 %s1920_s3, 4  ;;  %s64_s8 = int_to_ptr.vmem [resolvable:$true] %s63_s8  ;;  %s48_s4 = int_to_ptr.hbm [resolvable:$true] %s47_s4 }
   0x9   :  { %66 = dma.hbm_to_vmem [thread:$0]  %s62_s28, 64, %s64_s8, [#allocation9]  }
   0xa   :  { %s1518_s13 = smov [#allocation2]   ;;  %s1519_s15 = smov [#allocation7]  }
   0xb   :  { %s21_s14 = sshll.u32 %s1518_s13, 4  ;;  %s49_s16 = sshll.u32 %s1519_s15, 4  ;;  %s22_s14 = int_to_ptr.vmem [resolvable:$true] %s21_s14  ;;  %s50_s16 = int_to_ptr.vmem [resolvable:$true] %s49_s16 }
   0xc   :  { %27 = dma.hbm_to_vmem [thread:$0]  %s20_s1, 512, %s22_s14, [#allocation3], %s1515_s29, %s1515_s29, %s1516_s30  }
   0xd   :  { %s71_s0 = sshll.u32 %s1922_s5, 4  ;;  %s1520_s3 = smov [#allocation10]   ;;  %s72_s0 = int_to_ptr.hbm [resolvable:$true] %s71_s0 }
   0xe   :  { %55 = dma.hbm_to_vmem [thread:$0]  %s48_s4, 512, %s50_s16, [#allocation6], %s1515_s29, %s1515_s29, %s1516_s30  }
   0xf   :  { %s73_s19 = sshll.u32 %s1520_s3, 4  ;;  %s74_s19 = int_to_ptr.vmem [resolvable:$true] %s73_s19 }
  0x10   :  { %79 = dma.hbm_to_vmem [thread:$0]  %s72_s0, 512, %s74_s19, [#allocation9], %s1515_s29, %s1515_s29, %s1516_s30  }
  0x11   :  { %1506 = dma.done.wait [#allocation3], 512  }
  0x12   :  { %1507 = vsyncadd [#allocation3], 4294966784 }
  0x13   :  { %1508 = dma.done.wait [#allocation6], 1024  }
  0x14   :  { %1509 = vsyncadd [#allocation6], 4294966272 }
  0x15   :  { %1510 = dma.done.wait [#allocation9], 576  }
  0x16   :  { %1511 = vsyncadd [#allocation9], 4294966720  ;;  %v107_v0 = vld [vmem:[#allocation5 + $0x18] sm:$0xff]  ;;  %v106_v1 = vld [vmem:[#allocation5 + $0x10] sm:$0xff]  ;;  %vm112_vm0 = vcmask 261120   ;;  %s1521_s21 = smov 96  }
  0x17   :  { %137 = vmatpush.msra.mxu0 %v107_v0  ;;  %1219 = vmatpush.msra.mxu2 %v107_v0  ;;  %v105_v2 = vld [vmem:[#allocation5 + $0x8] sm:$0xff]  ;;  %v104_v3 = vld [vmem:[#allocation5] sm:$0xff]  ;;  %v102_v5 = vld [vmem:[#allocation2 + $0x10] sm:$0xff]  ;;  %vm174_vm1 = vcmask 64512   ;;  %s1523_s22 = smov 88   ;;  %s1524_s23 = smov 120  }
  0x18   :  { %v100_v4 = vld [vmem:[#allocation2] sm:$0xff]  ;;  %v101_v6 = vld [vmem:[#allocation2 + $0x8] sm:$0xff]  ;;  %v103_v7 = vld [vmem:[#allocation2 + $0x18] sm:$0xff]  ;;  %s1525_s24 = smov 80   ;;  %s1526_s25 = smov 72  }
  0x19   :  { %138 = vmatpush.msra.mxu0 %v106_v1  ;;  %1220 = vmatpush.msra.mxu2 %v106_v1  ;;  %v1283_v10 = vld [vmem:[%s1919_s2] ss:$0 sm:$0xff]  ;;  %v1627_v21 = vld [vmem:[#allocation10] sm:$0xff]  ;;  %v1631_v25 = vld [vmem:[#allocation10 + $0x8] sm:$0xff]  ;;  %s1522_s2 = smov 64   ;;  %s1527_s26 = smov 112  }
  0x1a   :  { %v1635_v29 = vld [vmem:[#allocation10 + $0x10] sm:$0xff]  ;;  %v1639_v33 = vld [vmem:[#allocation10 + $0x18] sm:$0xff]  ;;  %s1528_s27 = smov 104   ;;  %s1529_s28 = smov 56  }
  0x1b   :  { %139 = vmatpush.msra.mxu0 %v105_v2  ;;  %1221 = vmatpush.msra.mxu2 %v105_v2  ;;  %s1530_s7 = smov 48   ;;  %s1531_s8 = smov 40  }
  0x1c   :  { %s1533_s9 = smov [#allocation11]   ;;  %s1136_s12 = sshll.u32 %s1923_s6, 4  ;;  %s1137_s12 = int_to_ptr.hbm [resolvable:$true] %s1136_s12 }
  0x1d   :  { %140 = vmatpush.msra.mxu0 %v104_v3  ;;  %1222 = vmatpush.msra.mxu2 %v104_v3  ;;  %s1134_s10 = sshll.u32 %s1533_s9, 4  ;;  %s1135_s10 = int_to_ptr.vmem [resolvable:$true] %s1134_s10 }
  0x1e   :  { %1151 = vmatmul.msk.f32.vlgmr.msra.gmra.mxu0 %vm112_vm0, %v100_v4  ;;  %1153 = vmatmul.msk.f32.vlgmr.msra.gmra.mxu2 %vm112_vm0, %v102_v5 }
  0x26   :  { %1152 = vmatmul.msk.f32.gmra.mxu0 %vm112_vm0, %v101_v6  ;;  %1154 = vmatmul.msk.f32.gmra.mxu2 %vm112_vm0, %v103_v7 }
  0x9b   :  { %v142_v8 = vpop.f32.mrf.mxu0 }
  0x9c   :  { %v1608_v15 = vadd.f32 %v1283_v10, %v142_v8 }
  0xa1   :  { %v148_v9 = vpop.f32.mrf.mxu2 }
  0xa2   :  { %v1612_v16 = vadd.f32 %v1283_v10, %v148_v9 }
  0xa3   :  { %v145_v11 = vpop.f32.mrf.mxu0 }
  0xa4   :  { %v1603_v12 = vadd.f32 %v1283_v10, %v145_v11 }
  0xa6   :  { %168 = vrot.lane.b32.xlu1 %v1603_v12, %s1521_s21  ;;  %v1667_v61 = vpack.i.bf16 %v1608_v15, %v1603_v12 }
  0xa9   :  { %v151_v13 = vpop.f32.mrf.mxu2 }
  0xaa   :  { %v1606_v14 = vadd.f32 %v1283_v10, %v151_v13 }
  0xac   :  { %172 = vrot.lane.b32.xlu0 %v1606_v14, %s1521_s21  ;;  %v1645_v37 = vpack.i.bf16 %v1612_v16, %v1606_v14 }
  0xae   :  { %166 = vrot.lane.b32.xlu1 %v1608_v15, %s1521_s21 }
  0xb4   :  { %170 = vrot.lane.b32.xlu0 %v1612_v16, %s1521_s21 }
 0x118   :  { %v169_v18 = vpop.permute.xlu1 %168 }
 0x11e   :  { %v173_v17 = vpop.permute.xlu0 %172 }
 0x11f   :  { %1155 = vmatpush.xpose.msk.msra.mxu1 %vm174_vm1, %v173_v17  ;;  %v154_v17 = vld [vmem:[#allocation7] sm:$0xff] }
 0x120   :  { %v167_v20 = vpop.permute.xlu1 %166 }
 0x126   :  { %v171_v19 = vpop.permute.xlu0 %170 }
 0x127   :  { %1156 = vmatpush.xpose.msk.msra.mxu1 %vm174_vm1, %v171_v19 }
 0x12b   :  { %1157 = vmatpush.xpose.msk.msra.mxu1 %vm174_vm1, %v169_v18 }
 0x12f   :  { %1158 = vmatpush.xpose.msk.msra.mxu1 %vm174_vm1, %v167_v20 }
 0x132   :  { %1159 = vmatmul.msk.f32.vlgmr.msra.gmra.mxu1 %vm174_vm1, %v1608_v15 }
 0x133   :  { %567 = vmatpush.msrb.mxu1 %v154_v17 }
 0x13a   :  { %1160 = vmatmul.msk.f32.gmra.mxu1 %vm174_vm1, %v1603_v12 }
 0x142   :  { %1161 = vmatmul.msk.f32.gmra.mxu1 %vm174_vm1, %v1612_v16 }
 0x14a   :  { %1162 = vmatmul.msk.f32.gmra.mxu1 %vm174_vm1, %v1606_v14 }
 0x1af   :  { %v208_v22 = vpop.f32.mrf.mxu1 }
 0x1b0   :  { %v209_v23 = vadd.f32 %v208_v22, %v1627_v21 }
 0x1b2   :  { %v220_v24 = vsel %vm112_vm0, %v209_v23, -inf }
 0x1b3   :  { %221 = vmax.xlane.f32.xlu2 %v220_v24 }
 0x1b7   :  { %v211_v26 = vpop.f32.mrf.mxu1 }
 0x1b8   :  { %v212_v27 = vadd.f32 %v211_v26, %v1631_v25 }
 0x1ba   :  { %v223_v28 = vsel %vm112_vm0, %v212_v27, -inf }
 0x1bb   :  { %224 = vmax.xlane.f32.xlu2 %v223_v28 }
 0x1bf   :  { %v214_v30 = vpop.f32.mrf.mxu1 }
 0x1c0   :  { %v215_v31 = vadd.f32 %v214_v30, %v1635_v29 }
 0x1c2   :  { %v226_v32 = vsel %vm112_vm0, %v215_v31, -inf }
 0x1c3   :  { %227 = vmax.xlane.f32.xlu0 %v226_v32 }
 0x1c7   :  { %v217_v34 = vpop.f32.mrf.mxu1 }
 0x1c8   :  { %v218_v35 = vadd.f32 %v217_v34, %v1639_v33 }
 0x1ca   :  { %v229_v36 = vsel %vm112_vm0, %v218_v35, -inf }
 0x1cb   :  { %230 = vmax.xlane.f32.xlu1 %v229_v36 }
 0x1d3   :  { %1244 = vrot.lane.b32.xlu2 %v1645_v37, %s1522_s2 }
 0x226   :  { %v222_v38 = vpop.xlane.xlu2 %221 }
 0x227   :  { %v232_v39 = vsub.f32 %v209_v23, %v222_v38 }
 0x229   :  { %v236_v40 = vmul.f32 1.442695, %v232_v39 }
 0x22b   :  { %1284 = vpow2.f32 %v236_v40 }
 0x22e   :  { %v225_v41 = vpop.xlane.xlu2 %224 }
 0x22f   :  { %v233_v42 = vsub.f32 %v212_v27, %v225_v41 }
 0x231   :  { %v1649_v43 = vpop.eup %1284  ;;  %v238_v44 = vmul.f32 1.442695, %v233_v42 }
 0x232   :  { %v244_v45 = vsel %vm112_vm0, %v1649_v43, 0.0 }
 0x233   :  { %1286 = vpow2.f32 %v238_v44  ;;  %245 = vadd.xlane.f32.xlu2 %v244_v45 }
 0x236   :  { %v228_v46 = vpop.xlane.xlu0 %227  ;;  %v1245_v47 = vpop.permute.xlu2 %1244 }
 0x237   :  { %v234_v48 = vsub.f32 %v215_v31, %v228_v46  ;;  %v1246_v49 = vunpack.i.l.bf16 %v1245_v47  ;;  %v1247_v52 = vunpack.i.h.bf16 %v1245_v47 }
 0x239   :  { %v1653_v50 = vpop.eup %1286  ;;  %v240_v51 = vmul.f32 1.442695, %v234_v48  ;;  %312 = vmatpush.msrb.mxu2 %v1246_v49 }
 0x23a   :  { %v247_v53 = vsel %vm112_vm0, %v1653_v50, 0.0 }
 0x23b   :  { %1288 = vpow2.f32 %v240_v51  ;;  %248 = vadd.xlane.f32.xlu2 %v247_v53  ;;  %313 = vmatpush.msrb.mxu2 %v1247_v52 }
 0x23e   :  { %v231_v54 = vpop.xlane.xlu1 %230 }
 0x23f   :  { %v235_v55 = vsub.f32 %v218_v35, %v231_v54 }
 0x241   :  { %v1657_v56 = vpop.eup %1288  ;;  %v242_v57 = vmul.f32 1.442695, %v235_v55 }
 0x242   :  { %v250_v58 = vsel %vm112_vm0, %v1657_v56, 0.0 }
 0x243   :  { %1290 = vpow2.f32 %v242_v57  ;;  %251 = vadd.xlane.f32.xlu0 %v250_v58 }
 0x249   :  { %v1661_v59 = vpop.eup %1290 }
 0x24a   :  { %v253_v60 = vsel %vm112_vm0, %v1661_v59, 0.0 }
 0x24b   :  { %254 = vadd.xlane.f32.xlu1 %v253_v60 }
 0x253   :  { %1249 = vrot.lane.b32.xlu2 %v1667_v61, %s1522_s2 }
 0x257   :  { %341 = vrot.lane.b32.xlu0 %v1612_v16, %s1523_s22 }
 0x25b   :  { %343 = vrot.lane.b32.xlu2 %v1606_v14, %s1523_s22 }
 0x25f   :  { %331 = vrot.lane.b32.xlu0 %v1603_v12, %s1524_s23 }
 0x263   :  { %337 = vrot.lane.b32.xlu2 %v1608_v15, %s1523_s22 }
 0x264   :  { %339 = vrot.lane.b32.xlu1 %v1603_v12, %s1523_s22 }
 0x267   :  { %593 = vrot.lane.b32.xlu0 %v1612_v16, %s1525_s24 }
 0x26b   :  { %329 = vrot.lane.b32.xlu2 %v1608_v15, %s1524_s23 }
 0x26c   :  { %595 = vrot.lane.b32.xlu1 %v1606_v14, %s1525_s24 }
 0x26f   :  { %810 = vrot.lane.b32.xlu0 %v1606_v14, %s1526_s25 }
 0x273   :  { %333 = vrot.lane.b32.xlu2 %v1612_v16, %s1524_s23 }
 0x274   :  { %591 = vrot.lane.b32.xlu1 %v1603_v12, %s1525_s24 }
 0x277   :  { %581 = vrot.lane.b32.xlu0 %v1608_v15, %s1527_s26 }
 0x27b   :  { %335 = vrot.lane.b32.xlu2 %v1606_v14, %s1524_s23 }
 0x27c   :  { %808 = vrot.lane.b32.xlu1 %v1612_v16, %s1526_s25 }
 0x27f   :  { %583 = vrot.lane.b32.xlu0 %v1603_v12, %s1527_s26 }
 0x283   :  { %589 = vrot.lane.b32.xlu2 %v1608_v15, %s1525_s24 }
 0x284   :  { %804 = vrot.lane.b32.xlu1 %v1608_v15, %s1526_s25 }
 0x287   :  { %798 = vrot.lane.b32.xlu0 %v1603_v12, %s1528_s27 }
 0x28b   :  { %806 = vrot.lane.b32.xlu2 %v1603_v12, %s1526_s25 }
 0x28c   :  { %585 = vrot.lane.b32.xlu1 %v1612_v16, %s1527_s26 }
 0x28f   :  { %802 = vrot.lane.b32.xlu0 %v1606_v14, %s1528_s27 }
 0x293   :  { %796 = vrot.lane.b32.xlu2 %v1608_v15, %s1528_s27 }
 0x294   :  { %800 = vrot.lane.b32.xlu1 %v1612_v16, %s1528_s27 }
 0x29b   :  { %587 = vrot.lane.b32.xlu2 %v1606_v14, %s1527_s26 }
 0x2a6   :  { %v246_v62 = vpop.xlane.xlu2 %245 }
 0x2a7   :  { %1292 = vrcp.f32 %v246_v62 }
 0x2ad   :  { %v1293_v63 = vpop.eup %1292 }
 0x2ae   :  { %v260_v0 = vmul.f32 %v1293_v63, %v246_v62  ;;  %v249_v1 = vpop.xlane.xlu2 %248 }
 0x2af   :  { %1294 = vrcp.f32 %v249_v1 }
 0x2b0   :  { %v264_v2 = vsub.f32 2.0, %v260_v0 }
 0x2b2   :  { %v268_v4 = vmul.f32 %v1293_v63, %v264_v2 }
 0x2b4   :  { %v272_v10 = vmul.f32 %v1649_v43, %v268_v4 }
 0x2b5   :  { %v1295_v3 = vpop.eup %1294 }
 0x2b6   :  { %v261_v5 = vmul.f32 %v1295_v3, %v249_v1  ;;  %v252_v6 = vpop.xlane.xlu0 %251  ;;  %v1250_v7 = vpop.permute.xlu2 %1249 }
 0x2b7   :  { %1296 = vrcp.f32 %v252_v6  ;;  %v1251_v8 = vunpack.i.l.bf16 %v1250_v7  ;;  %v1252_v9 = vunpack.i.h.bf16 %v1250_v7 }
 0x2b8   :  { %v265_v11 = vsub.f32 2.0, %v261_v5 }
 0x2b9   :  { %314 = vmatpush.msrb.mxu2 %v1251_v8 }
 0x2ba   :  { %v269_v13 = vmul.f32 %v1295_v3, %v265_v11 }
 0x2bb   :  { %315 = vmatpush.msrb.mxu2 %v1252_v9 }
 0x2bc   :  { %1163 = vmatmul.msk.f32.vlgmr.msrb.gmra.mxu2 %vm112_vm0, %v272_v10  ;;  %v273_v19 = vmul.f32 %v1653_v50, %v269_v13 }
 0x2bd   :  { %v1297_v12 = vpop.eup %1296 }
 0x2be   :  { %v262_v14 = vmul.f32 %v1297_v12, %v252_v6  ;;  %v255_v15 = vpop.xlane.xlu1 %254  ;;  %v344_v16 = vpop.permute.xlu2 %343 }
 0x2bf   :  { %1298 = vrcp.f32 %v255_v15  ;;  %1167 = vmatpush.xpose.msk.msra.mxu3 %vm174_vm1, %v344_v16 }
 0x2c0   :  { %v266_v18 = vsub.f32 2.0, %v262_v14 }
 0x2c2   :  { %v270_v22 = vmul.f32 %v1297_v12, %v266_v18 }
 0x2c4   :  { %1164 = vmatmul.msk.f32.gmra.mxu2 %vm112_vm0, %v273_v19  ;;  %v274_v28 = vmul.f32 %v1657_v56, %v270_v22 }
 0x2c5   :  { %v1299_v20 = vpop.eup %1298 }
 0x2c6   :  { %v263_v23 = vmul.f32 %v1299_v20, %v255_v15  ;;  %v338_v24 = vpop.permute.xlu2 %337 }
 0x2c8   :  { %v267_v27 = vsub.f32 2.0, %v263_v23 }
 0x2c9   :  { %v342_v26 = vpop.permute.xlu0 %341 }
 0x2ca   :  { %1168 = vmatpush.xpose.msk.msra.mxu3 %vm174_vm1, %v342_v26  ;;  %v271_v30 = vmul.f32 %v1299_v20, %v267_v27 }
 0x2cc   :  { %1165 = vmatmul.msk.f32.gmra.mxu2 %vm112_vm0, %v274_v28  ;;  %v275_v34 = vmul.f32 %v1661_v59, %v271_v30 }
 0x2ce   :  { %v330_v31 = vpop.permute.xlu2 %329 }
 0x2d1   :  { %v332_v32 = vpop.permute.xlu0 %331 }
 0x2d4   :  { %1166 = vmatmul.msk.f32.gmra.mxu2 %vm112_vm0, %v275_v34 }
 0x2d6   :  { %v340_v35 = vpop.permute.xlu1 %339  ;;  %v334_v36 = vpop.permute.xlu2 %333 }
 0x2d7   :  { %1169 = vmatpush.xpose.msk.msra.mxu3 %vm174_vm1, %v340_v35 }
 0x2d9   :  { %v594_v38 = vpop.permute.xlu0 %593 }
 0x2db   :  { %1170 = vmatpush.xpose.msk.msra.mxu3 %vm174_vm1, %v338_v24 }
 0x2de   :  { %v596_v39 = vpop.permute.xlu1 %595  ;;  %1171 = vmatmul.msk.f32.vlgmr.msra.gmra.mxu3 %vm174_vm1, %v330_v31  ;;  %v336_v40 = vpop.permute.xlu2 %335 }
 0x2df   :  { %1187 = vmatpush.xpose.msk.msrb.mxu3 %vm174_vm1, %v596_v39 }
 0x2e1   :  { %v811_v41 = vpop.permute.xlu0 %810 }
 0x2e2   :  { %1203 = vmatpush.xpose.msk.msra.mxu1 %vm174_vm1, %v811_v41 }
 0x2e3   :  { %1188 = vmatpush.xpose.msk.msrb.mxu3 %vm174_vm1, %v594_v38 }
 0x2e6   :  { %v592_v42 = vpop.permute.xlu1 %591  ;;  %1172 = vmatmul.msk.f32.gmra.mxu3 %vm174_vm1, %v332_v32  ;;  %v590_v43 = vpop.permute.xlu2 %589 }
 0x2e7   :  { %1189 = vmatpush.xpose.msk.msrb.mxu3 %vm174_vm1, %v592_v42 }
 0x2e9   :  { %v582_v47 = vpop.permute.xlu0 %581 }
 0x2eb   :  { %1190 = vmatpush.xpose.msk.msrb.mxu3 %vm174_vm1, %v590_v43 }
 0x2ee   :  { %v809_v44 = vpop.permute.xlu1 %808  ;;  %1173 = vmatmul.msk.f32.gmra.mxu3 %vm174_vm1, %v334_v36  ;;  %v807_v45 = vpop.permute.xlu2 %806 }
 0x2ef   :  { %1204 = vmatpush.xpose.msk.msra.mxu1 %vm174_vm1, %v809_v44 }
 0x2f1   :  { %v584_v48 = vpop.permute.xlu0 %583 }
 0x2f3   :  { %1205 = vmatpush.xpose.msk.msra.mxu1 %vm174_vm1, %v807_v45 }
 0x2f6   :  { %v805_v46 = vpop.permute.xlu1 %804  ;;  %1174 = vmatmul.msk.f32.gmra.mxu3 %vm174_vm1, %v336_v40  ;;  %v797_v49 = vpop.permute.xlu2 %796 }
 0x2f7   :  { %1206 = vmatpush.xpose.msk.msra.mxu1 %vm174_vm1, %v805_v46 }
 0x2f9   :  { %v799_v59 = vpop.permute.xlu0 %798 }
 0x2fe   :  { %1191 = vmatmul.msk.f32.vlgmr.msrb.gmra.mxu3 %vm174_vm1, %v582_v47  ;;  %v586_v50 = vpop.permute.xlu1 %585  ;;  %v588_v51 = vpop.permute.xlu2 %587 }
 0x301   :  { %v803_v4 = vpop.permute.xlu0 %802 }
 0x306   :  { %1192 = vmatmul.msk.f32.gmra.mxu3 %vm174_vm1, %v584_v48  ;;  %v801_v0 = vpop.permute.xlu1 %800 }
 0x30e   :  { %1193 = vmatmul.msk.f32.gmra.mxu3 %vm174_vm1, %v586_v50 }
 0x316   :  { %1194 = vmatmul.msk.f32.gmra.mxu3 %vm174_vm1, %v588_v51 }
 0x33f   :  { %v317_v52 = vpop.f32.mrf.mxu2 }
 0x340   :  { %1183 = vmatmul.msk.f32.vlgmr.msrb.gmra.mxu1 %vm174_vm1, %v317_v52 }
 0x347   :  { %v320_v53 = vpop.f32.mrf.mxu2 }
 0x348   :  { %1184 = vmatmul.msk.f32.gmra.mxu1 %vm174_vm1, %v320_v53 }
 0x34f   :  { %v323_v54 = vpop.f32.mrf.mxu2 }
 0x350   :  { %1185 = vmatmul.msk.f32.gmra.mxu1 %vm174_vm1, %v323_v54 }
 0x357   :  { %v326_v55 = vpop.f32.mrf.mxu2 }
 0x358   :  { %1186 = vmatmul.msk.f32.gmra.mxu1 %vm174_vm1, %v326_v55 }
 0x360   :  { %1207 = vmatmul.msk.f32.vlgmr.msra.gmra.mxu1 %vm174_vm1, %v797_v49 }
 0x361   :  { %v378_v56 = vpop.f32.mrf.mxu3 }
 0x362   :  { %v379_v57 = vadd.f32 %v378_v56, %v1627_v21 }
 0x364   :  { %v390_v58 = vsel %vm112_vm0, %v379_v57, -inf }
 0x365   :  { %391 = vmax.xlane.f32.xlu2 %v390_v58 }
 0x368   :  { %1208 = vmatmul.msk.f32.gmra.mxu1 %vm174_vm1, %v799_v59 }
 0x369   :  { %v381_v60 = vpop.f32.mrf.mxu3 }
 0x36a   :  { %v382_v62 = vadd.f32 %v381_v60, %v1631_v25 }
 0x36c   :  { %v393_v63 = vsel %vm112_vm0, %v382_v62, -inf }
 0x36d   :  { %394 = vmax.xlane.f32.xlu1 %v393_v63 }
 0x370   :  { %1209 = vmatmul.msk.f32.gmra.mxu1 %vm174_vm1, %v801_v0 }
 0x371   :  { %v384_v1 = vpop.f32.mrf.mxu3 }
 0x372   :  { %v385_v2 = vadd.f32 %v384_v1, %v1635_v29 }
 0x374   :  { %v396_v3 = vsel %vm112_vm0, %v385_v2, -inf }
 0x375   :  { %397 = vmax.xlane.f32.xlu0 %v396_v3 }
 0x378   :  { %1210 = vmatmul.msk.f32.gmra.mxu1 %vm174_vm1, %v803_v4 }
 0x379   :  { %v387_v5 = vpop.f32.mrf.mxu3 }
 0x37a   :  { %v388_v6 = vadd.f32 %v387_v5, %v1639_v33 }
 0x37c   :  { %v399_v7 = vsel %vm112_vm0, %v388_v6, -inf }
 0x37d   :  { %400 = vmax.xlane.f32.xlu2 %v399_v7 }
 0x381   :  { %v630_v8 = vpop.f32.mrf.mxu3 }
 0x382   :  { %v631_v9 = vadd.f32 %v630_v8, %v1627_v21 }
 0x384   :  { %v642_v10 = vsel %vm112_vm0, %v631_v9, -inf }
 0x385   :  { %643 = vmax.xlane.f32.xlu1 %v642_v10 }
 0x389   :  { %v633_v11 = vpop.f32.mrf.mxu3 }
 0x38a   :  { %v634_v12 = vadd.f32 %v633_v11, %v1631_v25 }
 0x38c   :  { %v645_v13 = vsel %vm112_vm0, %v634_v12, -inf }
 0x38d   :  { %646 = vmax.xlane.f32.xlu2 %v645_v13 }
 0x391   :  { %v636_v14 = vpop.f32.mrf.mxu3 }
 0x392   :  { %v1744_v15 = vadd.f32 %v636_v14, %v1635_v29 }
 0x394   :  { %v648_v16 = vsel %vm112_vm0, %v1744_v15, -inf }
 0x395   :  { %649 = vmax.xlane.f32.xlu0 %v648_v16 }
 0x399   :  { %v639_v17 = vpop.f32.mrf.mxu3 }
 0x39a   :  { %v1749_v18 = vadd.f32 %v639_v17, %v1639_v33 }
 0x39c   :  { %v651_v19 = vsel %vm112_vm0, %v1749_v18, -inf }
 0x39d   :  { %652 = vmax.xlane.f32.xlu0 %v651_v19 }
 0x3a5   :  { %1259 = vrot.lane.b32.xlu2 %v1667_v61, %s1529_s28 }
 0x3b1   :  { %1254 = vrot.lane.b32.xlu0 %v1645_v37, %s1529_s28 }
 0x3bd   :  { %v1755_v20 = vpop.f32.mrf.mxu1 }
 0x3c5   :  { %v1757_v22 = vpop.f32.mrf.mxu1 }
 0x3cd   :  { %v1759_v27 = vpop.f32.mrf.mxu1 }
 0x3d5   :  { %v1765_v36 = vpop.f32.mrf.mxu1 }
 0x3d8   :  { %v392_v23 = vpop.xlane.xlu2 %391 }
 0x3d9   :  { %v402_v24 = vsub.f32 %v379_v57, %v392_v23 }
 0x3db   :  { %v406_v26 = vmul.f32 1.442695, %v402_v24 }
 0x3dd   :  { %1300 = vpow2.f32 %v406_v26  ;;  %v845_v45 = vpop.f32.mrf.mxu1 }
 0x3e0   :  { %v395_v28 = vpop.xlane.xlu1 %394 }
 0x3e1   :  { %v403_v30 = vsub.f32 %v382_v62, %v395_v28  ;;  %v1789_v62 = vadd.f32 %v845_v45, %v1627_v21 }
 0x3e3   :  { %v1761_v31 = vpop.eup %1300  ;;  %v408_v32 = vmul.f32 1.442695, %v403_v30  ;;  %v857_v1 = vsel %vm112_vm0, %v1789_v62, -inf }
 0x3e4   :  { %v414_v34 = vsel %vm112_vm0, %v1761_v31, 0.0 }
 0x3e5   :  { %1302 = vpow2.f32 %v408_v32  ;;  %415 = vadd.xlane.f32.xlu1 %v414_v34  ;;  %v848_v53 = vpop.f32.mrf.mxu1 }
 0x3e6   :  { %v1780_v54 = vadd.f32 %v848_v53, %v1631_v25 }
 0x3e8   :  { %v398_v35 = vpop.xlane.xlu0 %397  ;;  %v860_v60 = vsel %vm112_vm0, %v1780_v54, -inf }
 0x3e9   :  { %v404_v38 = vsub.f32 %v385_v2, %v398_v35 }
 0x3eb   :  { %v1767_v39 = vpop.eup %1302  ;;  %v410_v40 = vmul.f32 1.442695, %v404_v38 }
 0x3ec   :  { %v417_v41 = vsel %vm112_vm0, %v1767_v39, 0.0 }
 0x3ed   :  { %1304 = vpow2.f32 %v410_v40  ;;  %418 = vadd.xlane.f32.xlu1 %v417_v41  ;;  %v851_v25 = vpop.f32.mrf.mxu1 }
 0x3ee   :  { %v1798_v2 = vadd.f32 %v851_v25, %v1635_v29 }
 0x3f0   :  { %v401_v42 = vpop.xlane.xlu2 %400  ;;  %v863_v4 = vsel %vm112_vm0, %v1798_v2, -inf }
 0x3f1   :  { %v405_v43 = vsub.f32 %v388_v6, %v401_v42 }
 0x3f3   :  { %v1771_v44 = vpop.eup %1304  ;;  %v412_v46 = vmul.f32 1.442695, %v405_v43 }
 0x3f4   :  { %v420_v47 = vsel %vm112_vm0, %v1771_v44, 0.0 }
 0x3f5   :  { %1306 = vpow2.f32 %v412_v46  ;;  %421 = vadd.xlane.f32.xlu1 %v420_v47  ;;  %v854_v21 = vpop.f32.mrf.mxu1 }
 0x3f6   :  { %v1803_v5 = vadd.f32 %v854_v21, %v1639_v33 }
 0x3f8   :  { %v644_v48 = vpop.xlane.xlu1 %643  ;;  %v866_v7 = vsel %vm112_vm0, %v1803_v5, -inf }
 0x3f9   :  { %v654_v49 = vsub.f32 %v631_v9, %v644_v48 }
 0x3fb   :  { %v1775_v50 = vpop.eup %1306  ;;  %v658_v51 = vmul.f32 1.442695, %v654_v49 }
 0x3fc   :  { %v423_v52 = vsel %vm112_vm0, %v1775_v50, 0.0 }
 0x3fd   :  { %1308 = vpow2.f32 %v658_v51  ;;  %424 = vadd.xlane.f32.xlu1 %v423_v52 }
 0x400   :  { %v647_v55 = vpop.xlane.xlu2 %646 }
 0x401   :  { %v655_v56 = vsub.f32 %v634_v12, %v647_v55 }
 0x403   :  { %v1782_v57 = vpop.eup %1308  ;;  %v660_v58 = vmul.f32 1.442695, %v655_v56 }
 0x404   :  { %v666_v59 = vsel %vm112_vm0, %v1782_v57, 0.0 }
 0x405   :  { %1310 = vpow2.f32 %v660_v58  ;;  %667 = vadd.xlane.f32.xlu0 %v666_v59  ;;  %861 = vmax.xlane.f32.xlu1 %v860_v60 }
 0x408   :  { %v650_v3 = vpop.xlane.xlu0 %649  ;;  %v1260_v9 = vpop.permute.xlu2 %1259 }
 0x409   :  { %v1261_v33 = vunpack.i.l.bf16 %v1260_v9  ;;  %v1262_v11 = vunpack.i.h.bf16 %v1260_v9  ;;  %v656_v12 = vsub.f32 %v1744_v15, %v650_v3 }
 0x40b   :  { %v1791_v63 = vpop.eup %1310  ;;  %v662_v13 = vmul.f32 1.442695, %v656_v12 }
 0x40c   :  { %v669_v0 = vsel %vm112_vm0, %v1791_v63, 0.0 }
 0x40d   :  { %670 = vadd.xlane.f32.xlu2 %v669_v0  ;;  %858 = vmax.xlane.f32.xlu0 %v857_v1  ;;  %1312 = vpow2.f32 %v662_v13 }
 0x410   :  { %v1805_v6 = vpop.xlane.xlu0 %652 }
 0x413   :  { %v1814_v14 = vpop.eup %1312 }
 0x415   :  { %864 = vmax.xlane.f32.xlu2 %v863_v4 }
 0x41d   :  { %867 = vmax.xlane.f32.xlu2 %v866_v7 }
 0x41e   :  { %1264 = vrot.lane.b32.xlu1 %v1645_v37, %s1530_s7 }
 0x421   :  { %1269 = vrot.lane.b32.xlu0 %v1645_v37, %s1531_s8  ;;  %v672_v37 = vsel %vm112_vm0, %v1814_v14, 0.0 }
 0x423   :  { %v1255_v29 = vpop.permute.xlu0 %1254 }
 0x424   :  { %v1256_v8 = vunpack.i.l.bf16 %v1255_v29  ;;  %v1257_v10 = vunpack.i.h.bf16 %v1255_v29 }
 0x426   :  { %482 = vmatpush.msrb.mxu0 %v1256_v8 }
 0x428   :  { %483 = vmatpush.msrb.mxu0 %v1257_v10 }
 0x429   :  { %1279 = vrot.lane.b32.xlu0 %v1667_v61, %s1531_s8 }
 0x42a   :  { %484 = vmatpush.msrb.mxu0 %v1261_v33 }
 0x42c   :  { %485 = vmatpush.msrb.mxu0 %v1262_v11 }
 0x435   :  { %1274 = vrot.lane.b32.xlu2 %v1667_v61, %s1530_s7 }
 0x453   :  { %673 = vadd.xlane.f32.xlu0 %v672_v37 }
 0x458   :  { %v416_v16 = vpop.xlane.xlu1 %415 }
 0x459   :  { %1314 = vrcp.f32 %v416_v16 }
 0x45f   :  { %v1315_v17 = vpop.eup %1314 }
 0x460   :  { %v430_v19 = vmul.f32 %v1315_v17, %v416_v16  ;;  %v419_v23 = vpop.xlane.xlu1 %418 }
 0x461   :  { %1316 = vrcp.f32 %v419_v23 }
 0x462   :  { %v434_v24 = vsub.f32 2.0, %v430_v19 }
 0x464   :  { %v438_v26 = vmul.f32 %v1315_v17, %v434_v24 }
 0x466   :  { %v442_v61 = vmul.f32 %v1761_v31, %v438_v26 }
 0x467   :  { %v1317_v28 = vpop.eup %1316 }
 0x468   :  { %v431_v15 = vmul.f32 %v1317_v28, %v419_v23  ;;  %v422_v30 = vpop.xlane.xlu1 %421  ;;  %1175 = vmatmul.msk.f32.vlgmr.msrb.gmra.mxu0 %vm112_vm0, %v442_v61 }
 0x469   :  { %1318 = vrcp.f32 %v422_v30 }
 0x46a   :  { %v435_v32 = vsub.f32 2.0, %v431_v15 }
 0x46c   :  { %v439_v34 = vmul.f32 %v1317_v28, %v435_v32 }
 0x46e   :  { %v443_v35 = vmul.f32 %v1767_v39, %v439_v34 }
 0x46f   :  { %v1319_v38 = vpop.eup %1318 }
 0x470   :  { %v432_v40 = vmul.f32 %v1319_v38, %v422_v30  ;;  %v425_v41 = vpop.xlane.xlu1 %424  ;;  %1176 = vmatmul.msk.f32.gmra.mxu0 %vm112_vm0, %v443_v35 }
 0x471   :  { %1320 = vrcp.f32 %v425_v41 }
 0x472   :  { %v436_v42 = vsub.f32 2.0, %v432_v40  ;;  %v155_v40 = vld [vmem:[#allocation7 + $0x8] sm:$0xff] }
 0x473   :  { %526 = vmatpush.msra.mxu2 %v155_v40 }
 0x474   :  { %v440_v43 = vmul.f32 %v1319_v38, %v436_v42 }
 0x476   :  { %v444_v31 = vmul.f32 %v1771_v44, %v440_v43 }
 0x477   :  { %v1321_v45 = vpop.eup %1320 }
 0x478   :  { %v433_v46 = vmul.f32 %v1321_v45, %v425_v41  ;;  %v668_v47 = vpop.xlane.xlu0 %667  ;;  %1177 = vmatmul.msk.f32.gmra.mxu0 %vm112_vm0, %v444_v31  ;;  %v862_v53 = vpop.xlane.xlu1 %861 }
 0x479   :  { %v870_v58 = vsub.f32 %v1780_v54, %v862_v53 }
 0x47a   :  { %v437_v48 = vsub.f32 2.0, %v433_v46 }
 0x47b   :  { %v875_v44 = vmul.f32 1.442695, %v870_v58 }
 0x47c   :  { %v441_v49 = vmul.f32 %v1321_v45, %v437_v48 }
 0x47e   :  { %v445_v51 = vmul.f32 %v1775_v50, %v441_v49  ;;  %v657_v50 = vsub.f32 %v1749_v18, %v1805_v6  ;;  %v156_v49 = vld [vmem:[#allocation7 + $0x10] sm:$0xff] }
 0x47f   :  { %778 = vmatpush.msrb.mxu2 %v156_v49 }
 0x480   :  { %v671_v39 = vpop.xlane.xlu2 %670  ;;  %1178 = vmatmul.msk.f32.gmra.mxu0 %vm112_vm0, %v445_v51  ;;  %v859_v52 = vpop.xlane.xlu0 %858  ;;  %v664_v54 = vmul.f32 1.442695, %v657_v50 }
 0x481   :  { %v869_v55 = vsub.f32 %v1789_v62, %v859_v52 }
 0x483   :  { %v873_v56 = vmul.f32 1.442695, %v869_v55 }
 0x485   :  { %1322 = vpow2.f32 %v873_v56 }
 0x486   :  { %1324 = vrcp.f32 %v668_v47 }
 0x487   :  { %1326 = vpow2.f32 %v875_v44 }
 0x488   :  { %v865_v59 = vpop.xlane.xlu2 %864 }
 0x489   :  { %v871_v60 = vsub.f32 %v1798_v2, %v865_v59 }
 0x48b   :  { %v1829_v25 = vpop.eup %1322  ;;  %v877_v0 = vmul.f32 1.442695, %v871_v60 }
 0x48c   :  { %v881_v1 = vsel %vm112_vm0, %v1829_v25, 0.0  ;;  %v1325_v62 = vpop.eup %1324 }
 0x48d   :  { %1328 = vpow2.f32 %v877_v0  ;;  %882 = vadd.xlane.f32.xlu1 %v881_v1  ;;  %v682_v3 = vmul.f32 %v1325_v62, %v668_v47  ;;  %v1835_v2 = vpop.eup %1326 }
 0x48e   :  { %1330 = vrcp.f32 %v671_v39  ;;  %v884_v12 = vsel %vm112_vm0, %v1835_v2, 0.0 }
 0x48f   :  { %1332 = vpow2.f32 %v664_v54  ;;  %v686_v8 = vsub.f32 2.0, %v682_v3 }
 0x490   :  { %v868_v4 = vpop.xlane.xlu2 %867  ;;  %v1265_v21 = vpop.permute.xlu1 %1264 }
 0x491   :  { %v1266_v7 = vunpack.i.l.bf16 %v1265_v21  ;;  %v1267_v18 = vunpack.i.h.bf16 %v1265_v21  ;;  %v872_v9 = vsub.f32 %v1803_v5, %v868_v4  ;;  %v690_v37 = vmul.f32 %v1325_v62, %v686_v8 }
 0x493   :  { %v1837_v29 = vpop.eup %1328  ;;  %734 = vmatpush.msra.mxu0 %v1266_v7  ;;  %v1270_v6 = vpop.permute.xlu0 %1269  ;;  %v879_v17 = vmul.f32 1.442695, %v872_v9  ;;  %v694_v61 = vmul.f32 %v1782_v57, %v690_v37 }
 0x494   :  { %v1271_v10 = vunpack.i.l.bf16 %v1270_v6  ;;  %v887_v33 = vsel %vm112_vm0, %v1837_v29, 0.0  ;;  %v1331_v11 = vpop.eup %1330  ;;  %v1272_v13 = vunpack.i.h.bf16 %v1270_v6 }
 0x495   :  { %888 = vadd.xlane.f32.xlu2 %v887_v33  ;;  %735 = vmatpush.msra.mxu0 %v1267_v18  ;;  %v683_v16 = vmul.f32 %v1331_v11, %v671_v39  ;;  %v1844_v23 = vpop.eup %1332  ;;  %1334 = vpow2.f32 %v879_v17  ;;  %v157_v17 = vld [vmem:[#allocation7 + $0x18] sm:$0xff] }
 0x496   :  { %885 = vadd.xlane.f32.xlu1 %v884_v12  ;;  %949 = vmatpush.msra.mxu3 %v1271_v10  ;;  %v675_v30 = vsel %vm112_vm0, %v1844_v23, 0.0 }
 0x497   :  { %v687_v28 = vsub.f32 2.0, %v683_v16 }
 0x498   :  { %v1275_v19 = vpop.permute.xlu2 %1274  ;;  %950 = vmatpush.msra.mxu3 %v1272_v13 }
 0x499   :  { %v1276_v5 = vunpack.i.l.bf16 %v1275_v19  ;;  %v1277_v24 = vunpack.i.h.bf16 %v1275_v19  ;;  %v691_v34 = vmul.f32 %v1331_v11, %v687_v28 }
 0x49b   :  { %736 = vmatpush.msra.mxu0 %v1276_v5  ;;  %v1280_v26 = vpop.permute.xlu0 %1279  ;;  %v1850_v35 = vpop.eup %1334  ;;  %v695_v38 = vmul.f32 %v1791_v63, %v691_v34  ;;  %v1880_v34 = vld [vmem:[#allocation8] sm:$0x7] }
 0x49c   :  { %v1281_v15 = vunpack.i.l.bf16 %v1280_v26  ;;  %v1282_v32 = vunpack.i.h.bf16 %v1280_v26  ;;  %v890_v57 = vsel %vm112_vm0, %v1850_v35, 0.0 }
 0x49d   :  { %737 = vmatpush.msra.mxu0 %v1277_v24 }
 0x49e   :  { %676 = vadd.xlane.f32.xlu1 %v675_v30  ;;  %1195 = vmatmul.msk.f32.vlgmr.msra.gmra.mxu0 %vm112_vm0, %v694_v61 }
 0x49f   :  { %951 = vmatpush.msra.mxu3 %v1281_v15  ;;  %993 = vmatpush.msrb.mxu0 %v157_v17 }
 0x4a1   :  { %952 = vmatpush.msra.mxu3 %v1282_v32 }
 0x4a6   :  { %891 = vadd.xlane.f32.xlu1 %v890_v57  ;;  %1196 = vmatmul.msk.f32.gmra.mxu0 %vm112_vm0, %v695_v38  ;;  %v1012_v57 = vperm.slane %v1880_v34, 0 }
 0x4c6   :  { %v674_v41 = vpop.xlane.xlu0 %673 }
 0x4c7   :  { %1336 = vrcp.f32 %v674_v41 }
 0x4cd   :  { %v1337_v42 = vpop.eup %1336 }
 0x4ce   :  { %v684_v43 = vmul.f32 %v1337_v42, %v674_v41 }
 0x4d0   :  { %v688_v31 = vsub.f32 2.0, %v684_v43 }
 0x4d2   :  { %v692_v45 = vmul.f32 %v1337_v42, %v688_v31  ;;  %v1358_v31 = vld [vmem:[#allocation2] sm:$0xff] }
 0x4d4   :  { %v696_v46 = vmul.f32 %v1814_v14, %v692_v45 }
 0x4d6   :  { %1197 = vmatmul.msk.f32.gmra.mxu0 %vm112_vm0, %v696_v46 }
 0x4e5   :  { %v487_v47 = vpop.f32.mrf.mxu0 }
 0x4e6   :  { %1179 = vmatmul.msk.f32.vlgmr.msra.gmra.mxu2 %vm174_vm1, %v487_v47 }
 0x4ed   :  { %v490_v63 = vpop.f32.mrf.mxu0 }
 0x4ee   :  { %1180 = vmatmul.msk.f32.gmra.mxu2 %vm174_vm1, %v490_v63 }
 0x4f5   :  { %v493_v48 = vpop.f32.mrf.mxu0 }
 0x4f6   :  { %1181 = vmatmul.msk.f32.gmra.mxu2 %vm174_vm1, %v493_v48 }
 0x4fd   :  { %v496_v51 = vpop.f32.mrf.mxu0 }
 0x4fe   :  { %1182 = vmatmul.msk.f32.gmra.mxu2 %vm174_vm1, %v496_v51 }
 0x500   :  { %v883_v39 = vpop.xlane.xlu1 %882 }
 0x501   :  { %1338 = vrcp.f32 %v883_v39 }
 0x507   :  { %v1339_v52 = vpop.eup %1338 }
 0x508   :  { %v897_v14 = vmul.f32 %v1339_v52, %v883_v39  ;;  %v889_v53 = vpop.xlane.xlu2 %888 }
 0x509   :  { %1340 = vrcp.f32 %v889_v53  ;;  %v886_v55 = vpop.xlane.xlu1 %885 }
 0x50a   :  { %v901_v56 = vsub.f32 2.0, %v897_v14  ;;  %1342 = vrcp.f32 %v886_v55 }
 0x50c   :  { %v905_v58 = vmul.f32 %v1339_v52, %v901_v56  ;;  %v1359_v52 = vld [vmem:[#allocation2 + $0x8] sm:$0xff] }
 0x50e   :  { %v909_v44 = vmul.f32 %v1829_v25, %v905_v58 }
 0x50f   :  { %v1341_v59 = vpop.eup %1340 }
 0x510   :  { %v1343_v60 = vpop.eup %1342  ;;  %1211 = vmatmul.msk.f32.vlgmr.msra.gmra.mxu3 %vm112_vm0, %v909_v44  ;;  %v899_v1 = vmul.f32 %v1341_v59, %v889_v53 }
 0x511   :  { %v898_v50 = vmul.f32 %v1343_v60, %v886_v55  ;;  %v677_v0 = vpop.xlane.xlu1 %676 }
 0x512   :  { %1344 = vrcp.f32 %v677_v0  ;;  %v903_v3 = vsub.f32 2.0, %v899_v1 }
 0x513   :  { %v902_v62 = vsub.f32 2.0, %v898_v50 }
 0x514   :  { %v907_v25 = vmul.f32 %v1341_v59, %v903_v3  ;;  %v1361_v3 = vld [vmem:[#allocation2 + $0x18] sm:$0xff] }
 0x515   :  { %v906_v54 = vmul.f32 %v1343_v60, %v902_v62  ;;  %v1360_v60 = vld [vmem:[#allocation2 + $0x10] sm:$0xff] }
 0x516   :  { %v911_v33 = vmul.f32 %v1837_v29, %v907_v25 }
 0x517   :  { %v910_v4 = vmul.f32 %v1835_v2, %v906_v54 }
 0x518   :  { %v1345_v21 = vpop.eup %1344 }
 0x519   :  { %v685_v7 = vmul.f32 %v1345_v21, %v677_v0  ;;  %v892_v18 = vpop.xlane.xlu1 %891  ;;  %1212 = vmatmul.msk.f32.gmra.mxu3 %vm112_vm0, %v910_v4 }
 0x51a   :  { %1346 = vrcp.f32 %v892_v18 }
 0x51b   :  { %v689_v6 = vsub.f32 2.0, %v685_v7  ;;  %v739_v8 = vpop.f32.mrf.mxu0  ;;  %v1532_v7 = vmov 32.0  }
 0x51c   :  { %1199 = vmatmul.msk.f32.vlgmr.msrb.gmra.mxu2 %vm174_vm1, %v739_v8  ;;  %1348 = vrcp.f32 %v1532_v7 }
 0x51d   :  { %v693_v9 = vmul.f32 %v1345_v21, %v689_v6 }
 0x51f   :  { %v697_v10 = vmul.f32 %v1844_v23, %v693_v9 }
 0x520   :  { %v1347_v11 = vpop.eup %1346 }
 0x521   :  { %v900_v12 = vmul.f32 %v1347_v11, %v892_v18  ;;  %1198 = vmatmul.msk.f32.gmra.mxu0 %vm112_vm0, %v697_v10  ;;  %1213 = vmatmul.msk.f32.gmra.mxu3 %vm112_vm0, %v911_v33 }
 0x522   :  { %v1349_v18 = vpop.eup %1348 }
 0x523   :  { %v904_v2 = vsub.f32 2.0, %v900_v12  ;;  %v742_v13 = vpop.f32.mrf.mxu0  ;;  %v1034_v25 = vmul.f32 32.0, %v1349_v18  ;;  %vm1038_vm2 = vweird.f32 %v1349_v18 }
 0x524   :  { %1200 = vmatmul.msk.f32.gmra.mxu2 %vm174_vm1, %v742_v13 }
 0x525   :  { %v908_v37 = vmul.f32 %v1347_v11, %v904_v2  ;;  %v1035_v6 = vsub.f32 1.0, %v1034_v25 }
 0x527   :  { %v912_v16 = vmul.f32 %v1850_v35, %v908_v37 }
 0x529   :  { %1214 = vmatmul.msk.f32.gmra.mxu3 %vm112_vm0, %v912_v16 }
 0x553   :  { %v745_v19 = vpop.f32.mrf.mxu0 }
 0x554   :  { %1201 = vmatmul.msk.f32.gmra.mxu2 %vm174_vm1, %v745_v19 }
 0x569   :  { %v528_v61 = vpop.f32.mrf.mxu2 }
 0x56a   :  { %v570_v35 = vadd.f32 %v1755_v20, %v528_v61 }
 0x571   :  { %v531_v28 = vpop.f32.mrf.mxu2 }
 0x572   :  { %v573_v46 = vadd.f32 %v1757_v22, %v531_v28 }
 0x579   :  { %v534_v15 = vpop.f32.mrf.mxu2 }
 0x57a   :  { %v576_v20 = vadd.f32 %v1759_v27, %v534_v15 }
 0x581   :  { %v537_v30 = vpop.f32.mrf.mxu2 }
 0x582   :  { %v579_v59 = vadd.f32 %v1765_v36, %v537_v30  ;;  %v1036_v36 = vmul.f32 %v1349_v18, %v1035_v6 }
 0x584   :  { %v1037_v8 = vadd.f32 %v1349_v18, %v1036_v36 }
 0x586   :  { %v1039_v9 = vsel %vm1038_vm2, %v1349_v18, %v1037_v8 }
 0x593   :  { %v954_v29 = vpop.f32.mrf.mxu3 }
 0x594   :  { %1215 = vmatmul.msk.f32.vlgmr.msrb.gmra.mxu0 %vm174_vm1, %v954_v29 }
 0x59c   :  { %v957_v23 = vpop.f32.mrf.mxu3 }
 0x59d   :  { %1216 = vmatmul.msk.f32.gmra.mxu0 %vm174_vm1, %v957_v23 }
 0x59e   :  { %v748_v5 = vpop.f32.mrf.mxu0 }
 0x59f   :  { %1202 = vmatmul.msk.f32.gmra.mxu2 %vm174_vm1, %v748_v5  ;;  %v780_v32 = vpop.f32.mrf.mxu2 }
 0x5a0   :  { %v792_v38 = vadd.f32 %v780_v32, %v570_v35 }
 0x5a4   :  { %v960_v24 = vpop.f32.mrf.mxu3 }
 0x5a5   :  { %1217 = vmatmul.msk.f32.gmra.mxu0 %vm174_vm1, %v960_v24 }
 0x5a7   :  { %v783_v43 = vpop.f32.mrf.mxu2 }
 0x5a8   :  { %v793_v63 = vadd.f32 %v783_v43, %v573_v46 }
 0x5ac   :  { %v963_v26 = vpop.f32.mrf.mxu3 }
 0x5ad   :  { %1218 = vmatmul.msk.f32.gmra.mxu0 %vm174_vm1, %v963_v26 }
 0x5d7   :  { %v786_v39 = vpop.f32.mrf.mxu2 }
 0x5d8   :  { %v794_v53 = vadd.f32 %v786_v39, %v576_v20  ;;  %v1116_v20 = vperm.slane %v1880_v34, 1 }
 0x611   :  { %v995_v40 = vpop.f32.mrf.mxu0 }
 0x612   :  { %v1007_v41 = vadd.f32 %v995_v40, %v792_v38 }
 0x614   :  { %v1013_v42 = vadd.f32 %v1012_v57, %v1007_v41 }
 0x616   :  { %v1017_v45 = vadd.f32 %v1358_v31, %v1013_v42 }
 0x618   :  { %v1021_v47 = vsel %vm112_vm0, %v1017_v45, 0.0 }
 0x619   :  { %1022 = vadd.xlane.f32.xlu1 %v1021_v47 }
 0x61a   :  { %v998_v48 = vpop.f32.mrf.mxu0 }
 0x61b   :  { %v1008_v49 = vadd.f32 %v998_v48, %v793_v63 }
 0x61d   :  { %v1014_v51 = vadd.f32 %v1012_v57, %v1008_v49 }
 0x61f   :  { %v1018_v14 = vadd.f32 %v1359_v52, %v1014_v51 }
 0x621   :  { %v1024_v55 = vsel %vm112_vm0, %v1018_v14, 0.0 }
 0x622   :  { %v1001_v56 = vpop.f32.mrf.mxu0  ;;  %1025 = vadd.xlane.f32.xlu1 %v1024_v55  ;;  %v789_v22 = vpop.f32.mrf.mxu2 }
 0x623   :  { %v1009_v58 = vadd.f32 %v1001_v56, %v794_v53  ;;  %v795_v0 = vadd.f32 %v789_v22, %v579_v59  ;;  %v1121_v53 = vperm.slane %v1880_v34, 2 }
 0x625   :  { %v1015_v44 = vadd.f32 %v1012_v57, %v1009_v58 }
 0x627   :  { %v1019_v50 = vadd.f32 %v1360_v60, %v1015_v44 }
 0x629   :  { %v1027_v1 = vsel %vm112_vm0, %v1019_v50, 0.0 }
 0x62a   :  { %v1004_v62 = vpop.f32.mrf.mxu0  ;;  %1028 = vadd.xlane.f32.xlu1 %v1027_v1 }
 0x62b   :  { %v1010_v27 = vadd.f32 %v1004_v62, %v795_v0 }
 0x62d   :  { %v1016_v54 = vadd.f32 %v1012_v57, %v1010_v27 }
 0x62f   :  { %v1020_v4 = vadd.f32 %v1361_v3, %v1016_v54 }
 0x631   :  { %v1030_v21 = vsel %vm112_vm0, %v1020_v4, 0.0 }
 0x632   :  { %1031 = vadd.xlane.f32.xlu2 %v1030_v21 }
 0x68c   :  { %v1023_v10 = vpop.xlane.xlu1 %1022 }
 0x68d   :  { %v1040_v33 = vmul.f32 %v1039_v9, %v1023_v10 }
 0x68f   :  { %v1044_v11 = vsub.f32 %v1017_v45, %v1040_v33 }
 0x691   :  { %v1048_v12 = vmul.f32 %v1044_v11, %v1044_v11 }
 0x693   :  { %v1052_v2 = vsel %vm112_vm0, %v1048_v12, 0.0 }
 0x694   :  { %1053 = vadd.xlane.f32.xlu0 %v1052_v2 }
 0x695   :  { %v1026_v13 = vpop.xlane.xlu1 %1025 }
 0x696   :  { %v1041_v37 = vmul.f32 %v1039_v9, %v1026_v13 }
 0x698   :  { %v1045_v16 = vsub.f32 %v1018_v14, %v1041_v37 }
 0x69a   :  { %v1049_v17 = vmul.f32 %v1045_v16, %v1045_v16 }
 0x69c   :  { %v1055_v19 = vsel %vm112_vm0, %v1049_v17, 0.0 }
 0x69d   :  { %1056 = vadd.xlane.f32.xlu1 %v1055_v19  ;;  %v1029_v29 = vpop.xlane.xlu1 %1028 }
 0x69e   :  { %v1042_v23 = vmul.f32 %v1039_v9, %v1029_v29 }
 0x6a0   :  { %v1893_v5 = vsub.f32 %v1019_v50, %v1042_v23 }
 0x6a2   :  { %v1050_v24 = vmul.f32 %v1893_v5, %v1893_v5 }
 0x6a4   :  { %v1058_v26 = vsel %vm112_vm0, %v1050_v24, 0.0 }
 0x6a5   :  { %1059 = vadd.xlane.f32.xlu2 %v1058_v26  ;;  %v1032_v61 = vpop.xlane.xlu2 %1031 }
 0x6a6   :  { %v1043_v28 = vmul.f32 %v1039_v9, %v1032_v61 }
 0x6a8   :  { %v1898_v15 = vsub.f32 %v1020_v4, %v1043_v28 }
 0x6aa   :  { %v1051_v30 = vmul.f32 %v1898_v15, %v1898_v15 }
 0x6ac   :  { %v1061_v32 = vsel %vm112_vm0, %v1051_v30, 0.0 }
 0x6ad   :  { %1062 = vadd.xlane.f32.xlu0 %v1061_v32 }
 0x707   :  { %v1054_v35 = vpop.xlane.xlu0 %1053 }
 0x708   :  { %v1064_v38 = vmul.f32 %v1054_v35, %v1039_v9 }
 0x70a   :  { %v1068_v57 = vadd.f32 1e-05, %v1064_v38 }
 0x70c   :  { %1350 = vrsqrt.f32 %v1068_v57  ;;  %vm1078_vm4 = vweird.f32 %v1068_v57 }
 0x710   :  { %v1057_v40 = vpop.xlane.xlu1 %1056 }
 0x711   :  { %v1065_v41 = vmul.f32 %v1057_v40, %v1039_v9 }
 0x712   :  { %v1351_v42 = vpop.eup %1350 }
 0x713   :  { %v1073_v43 = vmul.f32 %v1351_v42, %v1068_v57  ;;  %v1069_v31 = vadd.f32 1e-05, %v1065_v41  ;;  %vm1079_vm3 = vweird.f32 %v1351_v42 }
 0x714   :  { %vm1080_vm5 = vmor %vm1078_vm4, %vm1079_vm3 }
 0x715   :  { %v1074_v45 = vmul.f32 %v1351_v42, %v1073_v43  ;;  %1352 = vrsqrt.f32 %v1069_v31  ;;  %vm1088_vm7 = vweird.f32 %v1069_v31 }
 0x717   :  { %v1075_v46 = vmul.f32 0.5, %v1074_v45 }
 0x718   :  { %v1060_v47 = vpop.xlane.xlu2 %1059 }
 0x719   :  { %v1076_v63 = vsub.f32 1.5, %v1075_v46  ;;  %v1066_v48 = vmul.f32 %v1060_v47, %v1039_v9 }
 0x71b   :  { %v1353_v49 = vpop.eup %1352  ;;  %v1077_v51 = vmul.f32 %v1351_v42, %v1076_v63  ;;  %v1070_v39 = vadd.f32 1e-05, %v1066_v48 }
 0x71c   :  { %v1083_v52 = vmul.f32 %v1353_v49, %v1069_v31  ;;  %vm1089_vm6 = vweird.f32 %v1353_v49 }
 0x71d   :  { %v1081_v14 = vsel %vm1080_vm5, %v1351_v42, %v1077_v51  ;;  %1354 = vrsqrt.f32 %v1070_v39  ;;  %vm1090_vm8 = vmor %vm1088_vm7, %vm1089_vm6  ;;  %vm1098_vm10 = vweird.f32 %v1070_v39 }
 0x71e   :  { %v1112_v55 = vmul.f32 %v1081_v14, %v1044_v11  ;;  %v1084_v56 = vmul.f32 %v1353_v49, %v1083_v52 }
 0x720   :  { %v1117_v58 = vmul.f32 %v1116_v20, %v1112_v55  ;;  %v1085_v44 = vmul.f32 0.5, %v1084_v56  ;;  %v1063_v22 = vpop.xlane.xlu0 %1062 }
 0x721   :  { %v1067_v59 = vmul.f32 %v1063_v22, %v1039_v9 }
 0x722   :  { %v1122_v60 = vadd.f32 %v1121_v53, %v1117_v58  ;;  %v1086_v50 = vsub.f32 1.5, %v1085_v44 }
 0x723   :  { %v1355_v0 = vpop.eup %1354  ;;  %v1071_v1 = vadd.f32 1e-05, %v1067_v59 }
 0x724   :  { %1126 = vst.msk [vmem:[#allocation11] sm:$0xff] %vm112_vm0, %v1122_v60  ;;  %v1087_v62 = vmul.f32 %v1353_v49, %v1086_v50  ;;  %v1093_v27 = vmul.f32 %v1355_v0, %v1070_v39  ;;  %vm1099_vm9 = vweird.f32 %v1355_v0 }
 0x725   :  { %1356 = vrsqrt.f32 %v1071_v1  ;;  %vm1100_vm11 = vmor %vm1098_vm10, %vm1099_vm9  ;;  %vm1108_vm13 = vweird.f32 %v1071_v1 }
 0x726   :  { %v1091_v54 = vsel %vm1090_vm8, %v1353_v49, %v1087_v62  ;;  %v1094_v34 = vmul.f32 %v1355_v0, %v1093_v27 }
 0x727   :  { %v1113_v3 = vmul.f32 %v1091_v54, %v1045_v16 }
 0x728   :  { %v1095_v4 = vmul.f32 0.5, %v1094_v34 }
 0x729   :  { %v1118_v21 = vmul.f32 %v1116_v20, %v1113_v3 }
 0x72a   :  { %v1096_v7 = vsub.f32 1.5, %v1095_v4 }
 0x72b   :  { %v1357_v18 = vpop.eup %1356  ;;  %v1123_v25 = vadd.f32 %v1121_v53, %v1118_v21 }
 0x72c   :  { %v1097_v6 = vmul.f32 %v1355_v0, %v1096_v7  ;;  %v1103_v36 = vmul.f32 %v1357_v18, %v1071_v1  ;;  %vm1109_vm12 = vweird.f32 %v1357_v18 }
 0x72d   :  { %1127 = vst.msk [vmem:[#allocation11 + $0x8] sm:$0xff] %vm112_vm0, %v1123_v25  ;;  %vm1110_vm14 = vmor %vm1108_vm13, %vm1109_vm12 }
 0x72e   :  { %v1101_v8 = vsel %vm1100_vm11, %v1355_v0, %v1097_v6  ;;  %v1104_v9 = vmul.f32 %v1357_v18, %v1103_v36 }
 0x72f   :  { %v1114_v10 = vmul.f32 %v1101_v8, %v1893_v5 }
 0x730   :  { %v1105_v33 = vmul.f32 0.5, %v1104_v9 }
 0x731   :  { %v1119_v11 = vmul.f32 %v1116_v20, %v1114_v10 }
 0x732   :  { %v1106_v12 = vsub.f32 1.5, %v1105_v33 }
 0x733   :  { %v1124_v2 = vadd.f32 %v1121_v53, %v1119_v11 }
 0x734   :  { %v1107_v13 = vmul.f32 %v1357_v18, %v1106_v12 }
 0x735   :  { %1128 = vst.msk [vmem:[#allocation11 + $0x10] sm:$0xff] %vm112_vm0, %v1124_v2 }
 0x736   :  { %v1111_v37 = vsel %vm1110_vm14, %v1357_v18, %v1107_v13 }
 0x737   :  { %v1115_v16 = vmul.f32 %v1111_v37, %v1898_v15 }
 0x739   :  { %v1120_v17 = vmul.f32 %v1116_v20, %v1115_v16 }
 0x73b   :  { %v1125_v19 = vadd.f32 %v1121_v53, %v1120_v17 }
 0x73d   :  { %1129 = vst.msk [vmem:[#allocation11 + $0x18] sm:$0xff] %vm112_vm0, %v1125_v19 }
 0x73e   :  { %1142 = dma.vmem_to_hbm [thread:$0]  %s1135_s10, 512, %s1137_s12, [#allocation4], %s1515_s29, %s1515_s29, %s1516_s30  }
 0x73f   :  { %1512 = dma.done.wait [#allocation4], 512  }
 0x740   :  { %1513 = vsyncadd [#allocation4], 4294966784 }
 0x741   :  { %1147 = vsyncpa [#allocation3], 1 }
 0x742   :  { %1148 = vsyncpa [#allocation6], 1 }
 0x743   :  { %1149 = vsyncpa [#allocation9], 1 }
 0x744   :  { %1150 = vsyncpa [#allocation4], 1 }

</bundles_post_ra>
